<compile_context>
chip_gen: v6e
topology: v6e:2x2x1
jax: 0.10.0
libtpu: 0.0.40
codegen_flags: <defaults>
</compile_context>

<pallas_src>
import jax
import jax.numpy as jnp
from jax.experimental import pallas as pl
from jax.experimental.pallas import tpu as pltpu

N_BINS = 10          # np.linspace(minVal, maxVal, 10)
LANE = 128           # lane width / lane-dense padding
MIB = 1024 * 1024


def _round_up(x, m):
    return (x + m - 1) // m * m


def _vmem_limit(buffer_bytes, headroom=16 * MIB):
    # Actual footprint + pipelining headroom, kept under the smallest physical
    # VMEM per TensorCore (v7x: 64 MiB).
    return int(min(buffer_bytes + headroom, 60 * MIB))


# ----------------------------- linear (MXU) kernel ---------------------------- #

def _linear_kernel(x_ref, w_ref, b_ref, o_ref):
    # o = x @ W.T + b.  W is (OUT_P, IN) in nn.Linear layout; contract dim 1
    # with dim 1 so no in-kernel transpose is needed.  bf16 operands, f32 acc.
    x = x_ref[...].astype(jnp.bfloat16)
    acc = jax.lax.dot_general(
        x, w_ref[...],
        dimension_numbers=(((1,), (1,)), ((), ())),
        preferred_element_type=jnp.float32,
    )                                                  # (tile_b, OUT_P)
    o_ref[...] = (acc + b_ref[...]).astype(o_ref.dtype)


@jax.jit
def _linear_forward(x, w_bf16, b_pad):
    B, IN = x.shape
    OUT_P = w_bf16.shape[0]
    tile_b = min(B, 256)                 # sweepable; 256 matches v6e/v7x MXU rows
    grid = (pl.cdiv(B, tile_b),)

    buf_bytes = (2 * tile_b * IN * 4        # x tile  (f32, double-buffered)
                 + 2 * tile_b * OUT_P * 4   # out tile (f32, double-buffered)
                 + OUT_P * IN * 2           # W (bf16, single-buffered)
                 + OUT_P * 4)               # bias (f32, single-buffered)

    return pl.pallas_call(
        _linear_kernel,
        grid=grid,
        in_specs=[
            pl.BlockSpec((tile_b, IN), lambda i: (i, 0)),
            # Grid-invariant blocks: single-buffered (halves their VMEM cost).
            pl.BlockSpec((OUT_P, IN), lambda i: (0, 0),
                         pipeline_mode=pl.Buffered(1)),
            pl.BlockSpec((1, OUT_P), lambda i: (0, 0),
                         pipeline_mode=pl.Buffered(1)),
        ],
        out_specs=pl.BlockSpec((tile_b, OUT_P), lambda i: (i, 0)),
        out_shape=jax.ShapeDtypeStruct((B, OUT_P), jnp.float32),
        compiler_params=pltpu.CompilerParams(
            dimension_semantics=("parallel",),   # megacore-splittable batch axis
            vmem_limit_bytes=_vmem_limit(buf_bytes),
        ),
    )(x, w_bf16, b_pad)


# ------------------------ weight-quantization kernel -------------------------- #
#
# Two-phase pass over row tiles of W (grid = (2, n_tiles)):
#   phase 0: running global min/max of W accumulated in SMEM scratch,
#   phase 1: bins = linspace(min, max, 10) (written once, lane-dense) and
#            ind  = digitize(W) per tile with an int8 edge-count accumulator.
# The ind out index_map is (p * i), so nothing is written back during phase 0.

def _quantize_kernel(w_ref, bins_ref, ind_ref, mm_ref):
    p = pl.program_id(0)       # 0: min/max pass, 1: digitize pass
    i = pl.program_id(1)       # row-tile index over OUT

    @pl.when(p == 0)
    def _():
        w = w_ref[...]
        first = i == 0
        tmn = jnp.min(w)
        tmx = jnp.max(w)
        mm_ref[0] = jnp.where(first, tmn, jnp.minimum(mm_ref[0], tmn))
        mm_ref[1] = jnp.where(first, tmx, jnp.maximum(mm_ref[1], tmx))

    @pl.when(p == 1)
    def _():
        w = w_ref[...]
        mn = mm_ref[0]
        mx = mm_ref[1]
        step = (mx - mn) / jnp.float32(N_BINS - 1)

        # bins = np.linspace(mn, mx, 10): endpoint forced to exactly mx
        # (np.linspace guarantees it).  Lane-dense padded (1, 128) row.
        @pl.when(i == 0)
        def _():
            lane = jax.lax.broadcasted_iota(jnp.int32, bins_ref.shape, 1)
            edges = mn + lane.astype(jnp.float32) * step
            bins_ref[...] = jnp.where(lane >= N_BINS - 1, mx, edges)

        # np.digitize(right=False): ind = #{k : bins[k] <= w}.  Exact edge
        # count (bit parity with np.digitize incl. w == mx -> 10); int8 acc.
        cnt = jnp.zeros(w.shape, jnp.int8)
        for k in range(N_BINS):
            edge = mx if k == N_BINS - 1 else mn + jnp.float32(k) * step
            cnt = cnt + (w >= edge).astype(jnp.int8)
        ind_ref[...] = cnt


@jax.jit
def _quantize_weights(w):
    OUT, IN = w.shape
    # Row tile must divide OUT exactly so edge padding never enters min/max.
    # TODO(synk): generalize to non-divisible OUT (mask the trailing tile).
    t_rows = 256 if OUT % 256 == 0 else (32 if OUT % 32 == 0 else OUT)
    n_tiles = OUT // t_rows

    buf_bytes = (2 * t_rows * IN * 4     # W tile  (f32, double-buffered)
                 + 2 * t_rows * IN       # ind tile (int8, double-buffered)
                 + 2 * LANE * 4)         # bins row

    return pl.pallas_call(
        _quantize_kernel,
        grid=(2, n_tiles),
        in_specs=[pl.BlockSpec((t_rows, IN), lambda p, i: (i, 0))],
        out_specs=(
            pl.BlockSpec((1, LANE), lambda p, i: (0, 0)),          # bins (revisited)
            pl.BlockSpec((t_rows, IN), lambda p, i: (p * i, 0)),   # ind
        ),
        out_shape=(
            jax.ShapeDtypeStruct((1, LANE), jnp.float32),
            jax.ShapeDtypeStruct((OUT, IN), jnp.int8),
        ),
        scratch_shapes=[pltpu.SMEM((2,), jnp.float32)],            # running min/max
        compiler_params=pltpu.CompilerParams(
            dimension_semantics=("arbitrary", "arbitrary"),
            vmem_limit_bytes=_vmem_limit(buf_bytes),
        ),
    )(w)


# ---------------------------------- wrapper ----------------------------------- #

class ModelWrapper:
    """JAX/Pallas analogue of the PyTorch ModelWrapper around nn.Linear."""

    def __init__(self, weight, bias):
        self.weight = weight                 # (OUT, IN), torch.nn.Linear layout
        self.bias = bias                     # (OUT,)
        self.weight_size = weight.shape
        self.bins = None
        self.ind = None

        out_f, in_f = weight.shape
        self._out_p = _round_up(out_f, LANE)
        # Pad once to a lane-dense OUT_P slab and pre-cast the MXU operand to
        # bf16; padded rows are zero so padded output columns are zero.
        self._w_bf16 = (jnp.zeros((self._out_p, in_f), jnp.bfloat16)
                        .at[:out_f].set(weight.astype(jnp.bfloat16)))
        self._b_pad = (jnp.zeros((1, self._out_p), jnp.float32)
                       .at[0, :out_f].set(bias.astype(jnp.float32)))

    def __call__(self, inputs):
        out_f = self.weight_size[0]
        out_pad = _linear_forward(inputs, self._w_bf16, self._b_pad)
        bins_row, ind8 = _quantize_weights(self.weight)
        # np.linspace returns a 1-D (10,) array; slice off the lane padding.
        self.bins = bins_row[0, :N_BINS]
        # np.digitize returns an integer array over W.view(-1); stored int8 in
        # HBM (values 1..10), widened to int32 here.
        self.ind = ind8.reshape(-1).astype(jnp.int32)
        return out_pad[:, :out_f]


# ----------------------------------- main -------------------------------------- #

if __name__ == "__main__":
    B, IN, OUT = 8, 32, 16

    key = jax.random.PRNGKey(0)
    k_x, k_w, k_b = jax.random.split(key, 3)

    x = jax.random.normal(k_x, (B, IN), dtype=jnp.float32)
    # Deterministic "nn.Linear"-style parameter init (uniform +-1/sqrt(IN)).
    bound = 1.0 / (IN ** 0.5)
    w = jax.random.uniform(k_w, (OUT, IN), jnp.float32, -bound, bound)
    b = jax.random.uniform(k_b, (OUT,), jnp.float32, -bound, bound)

    model = ModelWrapper(w, b)
    out = model(x)
    jax.block_until_ready(out)
    jax.block_until_ready(model.bins)
    jax.block_until_ready(model.ind)

    # ---- sanity checks against plain-JAX references ----
    assert out.shape == (B, OUT)

    # Linear runs with bf16 MXU operands / f32 accumulation; compare against a
    # reference with the same operand rounding.
    xb = x.astype(jnp.bfloat16).astype(jnp.float32)
    wb = w.astype(jnp.bfloat16).astype(jnp.float32)
    ref_out = xb @ wb.T + b
    assert jnp.allclose(out, ref_out, atol=1e-2, rtol=1e-2), "linear output mismatch"

    mn, mx = jnp.min(w), jnp.max(w)
    step = (mx - mn) / (N_BINS - 1)
    ref_bins = mn + jnp.arange(N_BINS, dtype=jnp.float32) * step
    ref_bins = ref_bins.at[-1].set(mx)          # np.linspace endpoint is exact
    ref_ind = jnp.sum(
        (w.reshape(-1)[:, None] >= ref_bins[None, :]).astype(jnp.int32), axis=1
    )
    assert jnp.allclose(model.bins, ref_bins, atol=1e-6), "bins mismatch"
    assert jnp.array_equal(model.ind, ref_ind), "digitize indices mismatch"

    print("KERNEL_OK")
</pallas_src>

<mosaic_0001>
module attributes {stable_mosaic.version = 11 : i64} {
  func.func @_linear_kernel(%arg0: i32, %arg1: memref<8x32xf32, #tpu.memory_space<vmem>>, %arg2: memref<128x32xbf16, #tpu.memory_space<vmem>>, %arg3: memref<1x128xf32, #tpu.memory_space<vmem>>, %arg4: memref<8x128xf32, #tpu.memory_space<vmem>>) attributes {dimension_semantics = [#tpu.dimension_semantics<parallel>], iteration_bounds = array<i64: 1>, scalar_prefetch = 0 : i64, scratch_operands = 0 : i64, tpu.core_type = #tpu.core_type<tc>, window_params = [{transform_indices = @transform_0, window_bounds = array<i64: 8, 32>}, {pipeline_mode = #tpu.pipeline_mode<synchronous>, transform_indices = @transform_1, window_bounds = array<i64: 128, 32>}, {pipeline_mode = #tpu.pipeline_mode<synchronous>, transform_indices = @transform_2, window_bounds = array<i64: 1, 128>}, {transform_indices = @transform_3, window_bounds = array<i64: 8, 128>}]} {
    %c0 = arith.constant 0 : index
    %c0_0 = arith.constant 0 : index
    %0 = vector.load %arg1[%c0, %c0_0] : memref<8x32xf32, #tpu.memory_space<vmem>>, vector<8x32xf32>
    %1 = arith.truncf %0 : vector<8x32xf32> to vector<8x32xbf16>
    %c0_1 = arith.constant 0 : index
    %c0_2 = arith.constant 0 : index
    %2 = vector.load %arg2[%c0_1, %c0_2] : memref<128x32xbf16, #tpu.memory_space<vmem>>, vector<128x32xbf16>
    %cst = arith.constant dense<0.000000e+00> : vector<8x128xf32>
    %3 = tpu.matmul %1, %2, %cst {dimension_numbers = #tpu.dot_dimension_numbers<[1], [1], [0], [0], [0, 0, 1, 0], [], []>} : vector<8x32xbf16>, vector<128x32xbf16>, vector<8x128xf32> -> vector<8x128xf32>
    %c0_3 = arith.constant 0 : index
    %c0_4 = arith.constant 0 : index
    %4 = vector.load %arg3[%c0_3, %c0_4] : memref<1x128xf32, #tpu.memory_space<vmem>>, vector<1x128xf32>
    %5 = vector.broadcast %4 : vector<1x128xf32> to vector<8x128xf32>
    %6 = arith.addf %3, %5 : vector<8x128xf32>
    %c0_5 = arith.constant 0 : index
    %c0_6 = arith.constant 0 : index
    %7 = vector.load %arg4[%c0_5, %c0_6] : memref<8x128xf32, #tpu.memory_space<vmem>>, vector<8x128xf32>
    tpu.vector_store %arg4[%c0_5, %c0_6], %6 {strides = array<i32>} : memref<8x128xf32, #tpu.memory_space<vmem>>, vector<8x128xf32>,
    return
  }
  func.func @transform_0(%arg0: i32) -> (i32, i32) {
    %c0_i32 = arith.constant 0 : i32
    %c0_i32_0 = arith.constant 0 : i32
    return %arg0, %c0_i32 : i32, i32
  }
  func.func @transform_1(%arg0: i32) -> (i32, i32) {
    %c0_i32 = arith.constant 0 : i32
    %c0_i32_0 = arith.constant 0 : i32
    %c0_i32_1 = arith.constant 0 : i32
    return %c0_i32, %c0_i32_0 : i32, i32
  }
  func.func @transform_2(%arg0: i32) -> (i32, i32) {
    %c0_i32 = arith.constant 0 : i32
    %c0_i32_0 = arith.constant 0 : i32
    %c0_i32_1 = arith.constant 0 : i32
    return %c0_i32, %c0_i32_0 : i32, i32
  }
  func.func @transform_3(%arg0: i32) -> (i32, i32) {
    %c0_i32 = arith.constant 0 : i32
    %c0_i32_0 = arith.constant 0 : i32
    return %arg0, %c0_i32 : i32, i32
  }
}

</mosaic_0001>

<bundles_post_ra>
// kernel: _linear_forward.1
= control target key start
LH: loop header
LB: loop body
LE: loop exit
PB: predicated region body
PF: predicated region fallthrough
CT: control target
= control target key end

     0   :  { %v236_v1 = vmov 0.0   ;;  %vm81_vm0 = vcmask 261120   ;;  %vm237_vm1 = vmmov 0   ;;  %s301_s0 = inlined_call_operand.vmem [shape: f32[8,32], index: 0, kind: input, shape index: {}]   ;;  %s302_s1 = inlined_call_operand.vmem [shape: bf16[128,32], index: 1, kind: input, shape index: {}]   ;;  %s303_s2 = inlined_call_operand.vmem [shape: f32[1,128], index: 2, kind: input, shape index: {}]   ;;  %s304_s3 = inlined_call_operand.hbm [shape: f32[8,128], index: 3, kind: output, shape index: {}]  }
   0x1   :  { %v206_v0 = vld [vmem:[%s302_s1 + $0x38] sm:$0xff]   ;;  %183 = vmatprep.subr.bf16.mxu0 %v236_v1  ;;  %v207_v3 = vld [vmem:[%s302_s1 + $0x30] sm:$0xff]   ;;  %199 = vmatprep.mubr.msk.bf16.mxu0 %vm237_vm1, %v236_v1 }
   0x2   :  { %v107_v2 = vsel %vm81_vm0, %v206_v0, 0  ;;  %v104_v4 = vsel %vm81_vm0, %v207_v3, 0 }
   0x3   :  { %184 = vmatpush3.bf16.xpose.msra.mxu0 %v107_v2 }
   0x4   :  { %185 = vmatprep.subr.bf16.mxu0 %v236_v1 }
   0x5   :  { %8 = vsyncpa [#allocation3], 0  ;;  %v208_v5 = vld [vmem:[%s302_s1 + $0x28] sm:$0xff]   ;;  %v209_v7 = vld [vmem:[%s302_s1 + $0x20] sm:$0xff]   ;;  %s238_s5 = smov [#allocation2]  }
   0x6   :  { %v101_v6 = vsel %vm81_vm0, %v208_v5, 0  ;;  %v98_v8 = vsel %vm81_vm0, %v209_v7, 0  ;;  %v210_v9 = vld [vmem:[%s302_s1 + $0x18] sm:$0xff]   ;;  %v211_v11 = vld [vmem:[%s302_s1 + $0x10] sm:$0xff]   ;;  %v212_v13 = vld [vmem:[%s302_s1 + $0x8] sm:$0xff]   ;;  %s156_s6 = sshll.u32 %s238_s5, 4  ;;  %s157_s6 = int_to_ptr.vmem [resolvable:$true] %s156_s6 }
   0x7   :  { %v95_v10 = vsel %vm81_vm0, %v210_v9, 0  ;;  %v92_v12 = vsel %vm81_vm0, %v211_v11, 0  ;;  %v89_v14 = vsel %vm81_vm0, %v212_v13, 0  ;;  %v213_v15 = vld [vmem:[%s302_s1] sm:$0xff]   ;;  %s214_s1 = scalar_lea.vmem %s157_s6, 128  ;;  %p219_p1 = scmp.lt.s32.totalorder %s157_s6, %s157_s6 }
   0x8   :  { %v86_v16 = vsel %vm81_vm0, %v213_v15, 0  ;;  %v16_v17 = vld [vmem:[%s301_s0] sm:$0xff]  ;;  %p215_p0 = scmp.ne.s32.totalorder %s157_s6, %s214_s1  ;;  %p220_p2 = scmp.lt.s32.totalorder %s214_s1, %s214_s1 }
   0x9   :  { %v17_v18 = vpack.c.bf16 %v16_v17, %v16_v17  ;;  %v164_v19 = vld [vmem:[%s303_s2] ss:$0 sm:$0xff] }
   0xa   :  { %p221_p3 = por %p220_p2, %p219_p1 }
   0xb   :  { %186 = vmatpush3.bf16.xpose.msra.mxu0 %v104_v4 }
   0xc   :  { %187 = vmatprep.subr.bf16.mxu0 %v236_v1  ;;  %p222_p4 = pnand %p221_p3, %p215_p0 }
  0x13   :  { %188 = vmatpush3.bf16.xpose.msra.mxu0 %v101_v6 }
  0x14   :  { %189 = vmatprep.subr.bf16.mxu0 %v236_v1 }
  0x1b   :  { %190 = vmatpush3.bf16.xpose.msra.mxu0 %v98_v8 }
  0x1c   :  { %191 = vmatprep.subr.bf16.mxu0 %v236_v1 }
  0x23   :  { %192 = vmatpush3.bf16.xpose.msra.mxu0 %v95_v10 }
  0x24   :  { %193 = vmatprep.subr.bf16.mxu0 %v236_v1 }
  0x2b   :  { %194 = vmatpush3.bf16.xpose.msra.mxu0 %v92_v12 }
  0x2c   :  { %195 = vmatprep.subr.bf16.mxu0 %v236_v1 }
  0x33   :  { %196 = vmatpush3.bf16.xpose.msra.mxu0 %v89_v14 }
  0x34   :  { %197 = vmatprep.subr.bf16.mxu0 %v236_v1 }
  0x3b   :  { %198 = vmatpush3.bf16.xpose.msra.mxu0 %v86_v16 }
  0x42   :  { %200 = vmatmul.mubr.msk.bf16.vlgmr.msra.gmra.mxu0 %vm81_vm0, %v17_v18 }
 0x102   :  { %v143_v20 = vpop.f32.mrf.mxu0 }
 0x103   :  { %v144_v21 = vadd.f32 %v164_v19, %v143_v20 }
 0x104   :  { %v201_v22 = vpop.f32.mrf.mxu0 }
 0x105   :  { %149 = vst [vmem:[#allocation2] sm:$0xff] %v144_v21 }
 0x106   :  { %v146_v23 = vpop.f32.mrf.mxu0 }
 0x107   :  { %225 = shalt.err (!%p222_p4)
}
 0x108   :  { %159 = dma.vmem_to_hbm [thread:$0]  %s157_s6, 128, %s304_s3, [#allocation3]   ;;  %v202_v24 = vpop.f32.mrf.mxu0 }
 0x109   :  { %234 = dma.done.wait [#allocation3], 128  }
 0x10a   :  { %235 = vsyncadd [#allocation3], 4294967168 }
 0x10b   :  { %163 = vsyncpa [#allocation3], 1 }

</bundles_post_ra>
